<compile_context>
chip_gen: v7x
topology: tpu7x:2x2x1
jax: 0.10.0
libtpu: 0.0.40
codegen_flags: <defaults>
</compile_context>

<pallas_src>
import functools

import jax
import jax.numpy as jnp
from jax.experimental import pallas as pl
from jax.experimental.pallas import tpu as pltpu


# --------------------------------------------------------------------------------------
# Kernels
# --------------------------------------------------------------------------------------
def _ffn_fused_kernel(x_ref, w1_ref, b1_ref, w2_ref, b2_ref, o_ref):
    """Whole-FFN per M tile: weights are VMEM-resident (constant index_map), no H grid axis."""
    pre = jnp.dot(x_ref[...], w1_ref[...], preferred_element_type=jnp.float32)
    act = jnp.maximum(pre + b1_ref[...], 0.0)                       # bias + ReLU in f32
    out = jnp.dot(act.astype(w2_ref.dtype), w2_ref[...],
                  preferred_element_type=jnp.float32)
    o_ref[...] = (out + b2_ref[...]).astype(o_ref.dtype)            # single fused cast/store


def _ffn_acc_kernel(x_ref, w1_ref, b1_ref, w2_ref, b2_ref, o_ref, acc_ref):
    """H tiled as a trailing 'arbitrary' reduction axis with an f32 VMEM accumulator."""
    h_idx = pl.program_id(1)

    pre = jnp.dot(x_ref[...], w1_ref[...], preferred_element_type=jnp.float32)
    act = jnp.maximum(pre + b1_ref[...], 0.0)
    contrib = jnp.dot(act.astype(w2_ref.dtype), w2_ref[...],
                      preferred_element_type=jnp.float32)

    @pl.when(h_idx == 0)
    def _():
        acc_ref[...] = contrib          # init with first product (no zero+add round trip)

    @pl.when(h_idx != 0)
    def _():
        acc_ref[...] += contrib

    @pl.when(h_idx == pl.num_programs(1) - 1)
    def _():
        o_ref[...] = (acc_ref[...] + b2_ref[...]).astype(o_ref.dtype)


# --------------------------------------------------------------------------------------
# Tile / VMEM planning
# --------------------------------------------------------------------------------------
def _round_up(x, m):
    return ((x + m - 1) // m) * m


def _vmem_capacity_bytes():
    try:
        cap = int(pltpu.get_tpu_info().vmem_capacity_bytes)
        if cap > 0:
            return cap
    except Exception:
        pass
    return 64 * 1024 * 1024  # conservative fallback (v7x per-TensorCore VMEM)


def _est_vmem_bytes(tm, th, E, H, in_bytes, out_bytes):
    resident = (th == H)
    b = 2 * in_bytes * tm * E                     # double-buffered x tile
    b += 2 * out_bytes * tm * E                   # double-buffered output tile
    b += 2 * in_bytes * (E * th + th * E)         # double-buffered w1/w2 blocks
    b += 2 * 4 * (th + E)                         # f32 biases
    b += (4 + in_bytes) * tm * th                 # f32 intermediate + low-precision copy
    if not resident:
        b += 4 * tm * E                           # f32 accumulator scratch
    return b


def _default_tm(M):
    if M >= 1024:
        return 512
    if M >= 128:
        # Ensure >=2 M tiles so the 'parallel' axis can shard across v7x's two TensorCores.
        return min(512, _round_up(-(-M // 2), 8))
    return _round_up(max(M, 8), 8)


def _pick_tiles(M, E, H, in_bytes, out_bytes, budget, tm, th):
    if tm is not None and th is not None:
        return tm, th

    tm0 = tm if tm is not None else _default_tm(M)
    tm_opts = [tm0]
    if tm is None:
        t = tm0
        while t > 64:
            t = _round_up(max(t // 2, 8), 8)
            if t != tm_opts[-1]:
                tm_opts.append(t)

    if th is not None:
        th_opts = [th]
    else:
        # Prefer fully-resident weights (th == H); fall back to 256-multiple slices.
        th_opts = [H] + [c for c in (1024, 512, 256, 128) if c < H and H % c == 0]

    for cand_th in th_opts:
        for cand_tm in tm_opts:
            if _est_vmem_bytes(cand_tm, cand_th, E, H, in_bytes, out_bytes) <= budget:
                return cand_tm, cand_th
    return tm_opts[-1], th_opts[-1]


# --------------------------------------------------------------------------------------
# Wrapper
# --------------------------------------------------------------------------------------
@functools.partial(jax.jit, static_argnames=("tm", "th", "compute_dtype", "out_dtype"))
def feed_forward_layer(x, w1, b1, w2, b2, *, tm=None, th=None,
                       compute_dtype=jnp.bfloat16, out_dtype=None):
    """x: [B, S, E].  w1: [E, 4E], b1: [4E], w2: [4E, E], b2: [E].  Returns [B, S, E]."""
    B, S, E = x.shape
    E_in, H = w1.shape
    assert E_in == E and w2.shape == (H, E) and b1.shape == (H,) and b2.shape == (E,)
    M = B * S
    out_dtype = x.dtype if out_dtype is None else jnp.dtype(out_dtype)

    in_bytes = jnp.dtype(compute_dtype).itemsize
    out_bytes = jnp.dtype(out_dtype).itemsize

    # ---- generation-aware VMEM budget + tile selection -------------------------------
    vmem_cap = _vmem_capacity_bytes()
    budget = int(vmem_cap * 0.8)
    tm, th = _pick_tiles(M, E, H, in_bytes, out_bytes, budget, tm, th)
    assert H % th == 0 and tm % 8 == 0

    Mp = _round_up(M, tm)
    n_m = Mp // tm
    nh = H // th
    resident = (nh == 1)

    # ---- operand prep (cast before pad; skip pad when aligned) -----------------------
    x2d = x.reshape(M, E).astype(compute_dtype)
    if Mp != M:
        x2d = jnp.pad(x2d, ((0, Mp - M), (0, 0)))
    w1c = w1.astype(compute_dtype)
    w2c = w2.astype(compute_dtype)
    b1_2d = b1.reshape(1, H).astype(jnp.float32)
    b2_2d = b2.reshape(1, E).astype(jnp.float32)

    est_vmem = _est_vmem_bytes(tm, th, E, H, in_bytes, out_bytes)
    vmem_limit = int(min(vmem_cap * 0.85,
                         max(32 * 1024 * 1024, est_vmem * 3 // 2 + (4 << 20))))

    weight_passes = 1 if resident else n_m   # weights re-streamed once per M tile otherwise
    cost = pl.CostEstimate(
        flops=4 * M * E * H,
        transcendentals=0,
        bytes_accessed=(Mp * E * in_bytes
                        + weight_passes * 2 * E * H * in_bytes
                        + (H + E) * 4
                        + Mp * E * out_bytes))

    if resident:
        grid_spec = pltpu.PrefetchScalarGridSpec(
            num_scalar_prefetch=0,
            grid=(n_m,),
            in_specs=[
                pl.BlockSpec((tm, E), lambda m: (m, 0)),   # x tile (streamed over m)
                pl.BlockSpec((E, H), lambda m: (0, 0)),    # w1: whole array, DMA'd once
                pl.BlockSpec((1, H), lambda m: (0, 0)),    # b1
                pl.BlockSpec((H, E), lambda m: (0, 0)),    # w2: whole array, DMA'd once
                pl.BlockSpec((1, E), lambda m: (0, 0)),    # b2
            ],
            out_specs=pl.BlockSpec((tm, E), lambda m: (m, 0)),
            scratch_shapes=[],
        )
        kernel = _ffn_fused_kernel
        dims = ("parallel",)
    else:
        grid_spec = pltpu.PrefetchScalarGridSpec(
            num_scalar_prefetch=0,
            grid=(n_m, nh),
            in_specs=[
                pl.BlockSpec((tm, E), lambda m, h: (m, 0)),   # x tile (constant over h)
                pl.BlockSpec((E, th), lambda m, h: (0, h)),   # w1 slice
                pl.BlockSpec((1, th), lambda m, h: (0, h)),   # b1 slice
                pl.BlockSpec((th, E), lambda m, h: (h, 0)),   # w2 slice
                pl.BlockSpec((1, E), lambda m, h: (0, 0)),    # b2
            ],
            out_specs=pl.BlockSpec((tm, E), lambda m, h: (m, 0)),
            scratch_shapes=[pltpu.VMEM((tm, E), jnp.float32)],
        )
        kernel = _ffn_acc_kernel
        dims = ("parallel", "arbitrary")

    out2d = pl.pallas_call(
        kernel,
        out_shape=jax.ShapeDtypeStruct((Mp, E), out_dtype),
        grid_spec=grid_spec,
        compiler_params=pltpu.CompilerParams(
            dimension_semantics=dims,
            vmem_limit_bytes=vmem_limit),
        cost_estimate=cost,
    )(x2d, w1c, b1_2d, w2c, b2_2d)

    if Mp != M:
        out2d = out2d[:M]
    return out2d.reshape(B, S, E)


# --------------------------------------------------------------------------------------
# Params + reference
# --------------------------------------------------------------------------------------
def init_params(key, embedding_size):
    """Deterministic init matching PyTorch nn.Linear shapes (weights stored transposed)."""
    E = embedding_size
    H = 4 * E
    k1, k2, k3, k4 = jax.random.split(key, 4)
    bound1 = 1.0 / (E ** 0.5)
    bound2 = 1.0 / (H ** 0.5)
    w1 = jax.random.uniform(k1, (E, H), jnp.float32, -bound1, bound1)
    b1 = jax.random.uniform(k2, (H,), jnp.float32, -bound1, bound1)
    w2 = jax.random.uniform(k3, (H, E), jnp.float32, -bound2, bound2)
    b2 = jax.random.uniform(k4, (E,), jnp.float32, -bound2, bound2)
    return w1, b1, w2, b2


def _reference(x, w1, b1, w2, b2):
    """Plain-JAX reference with the same bf16-matmul / f32-accumulate numerics."""
    B, S, E = x.shape
    xb = x.reshape(-1, E).astype(jnp.bfloat16)
    h = jnp.dot(xb, w1.astype(jnp.bfloat16), preferred_element_type=jnp.float32) + b1
    h = jnp.maximum(h, 0.0)
    y = jnp.dot(h.astype(jnp.bfloat16), w2.astype(jnp.bfloat16),
                preferred_element_type=jnp.float32) + b2
    return y.astype(x.dtype).reshape(B, S, E)


if __name__ == "__main__":
    key = jax.random.PRNGKey(0)

    # --- Test 1: module-sized shapes (batch=2, seq=8, E=32 -> H=128); resident path ---
    kx, kp = jax.random.split(key)
    B, S, E = 2, 8, 32
    x = jax.random.normal(kx, (B, S, E), jnp.float32)
    w1, b1, w2, b2 = init_params(kp, E)
    out = jax.block_until_ready(feed_forward_layer(x, w1, b1, w2, b2))
    ref = _reference(x, w1, b1, w2, b2)
    assert out.shape == (B, S, E)
    assert jnp.allclose(out, ref, atol=2e-2, rtol=2e-2)

    # --- Test 2: multi-tile M + H reduction grid (accumulator kernel) + M padding -----
    kx2, kp2 = jax.random.split(jax.random.PRNGKey(1))
    B2, S2, E2 = 2, 72, 128                       # M=144 (padded to 192), H=512
    x2 = jax.random.normal(kx2, (B2, S2, E2), jnp.float32)
    p2 = init_params(kp2, E2)
    out2 = jax.block_until_ready(feed_forward_layer(x2, *p2, tm=64, th=256))
    ref2 = _reference(x2, *p2)
    assert out2.shape == (B2, S2, E2)
    assert jnp.allclose(out2, ref2, atol=2e-2, rtol=2e-2)

    # --- Test 3: auto-tiling, >=2 M tiles with resident weights (fused kernel) --------
    kx3, kp3 = jax.random.split(jax.random.PRNGKey(2))
    B3, S3, E3 = 4, 64, 64                        # M=256 -> two m tiles, th=H=256
    x3 = jax.random.normal(kx3, (B3, S3, E3), jnp.float32)
    p3 = init_params(kp3, E3)
    out3 = jax.block_until_ready(feed_forward_layer(x3, *p3))
    ref3 = _reference(x3, *p3)
    assert out3.shape == (B3, S3, E3)
    assert jnp.allclose(out3, ref3, atol=2e-2, rtol=2e-2)

    print("KERNEL_OK")
</pallas_src>

<mosaic_0001>
module attributes {stable_mosaic.version = 11 : i64} {
  func.func @_ffn_fused_kernel(%arg0: i32, %arg1: memref<16x32xbf16, #tpu.memory_space<vmem>>, %arg2: memref<32x128xbf16, #tpu.memory_space<vmem>>, %arg3: memref<1x128xf32, #tpu.memory_space<vmem>>, %arg4: memref<128x32xbf16, #tpu.memory_space<vmem>>, %arg5: memref<1x32xf32, #tpu.memory_space<vmem>>, %arg6: memref<16x32xf32, #tpu.memory_space<vmem>>) attributes {dimension_semantics = [#tpu.dimension_semantics<parallel>], iteration_bounds = array<i64: 1>, scalar_prefetch = 0 : i64, scratch_operands = 0 : i64, tpu.core_type = #tpu.core_type<tc>, window_params = [{transform_indices = @transform_0, window_bounds = array<i64: 16, 32>}, {pipeline_mode = #tpu.pipeline_mode<synchronous>, transform_indices = @transform_1, window_bounds = array<i64: 32, 128>}, {pipeline_mode = #tpu.pipeline_mode<synchronous>, transform_indices = @transform_2, window_bounds = array<i64: 1, 128>}, {pipeline_mode = #tpu.pipeline_mode<synchronous>, transform_indices = @transform_3, window_bounds = array<i64: 128, 32>}, {pipeline_mode = #tpu.pipeline_mode<synchronous>, transform_indices = @transform_4, window_bounds = array<i64: 1, 32>}, {transform_indices = @transform_5, window_bounds = array<i64: 16, 32>}]} {
    %c0 = arith.constant 0 : index
    %c0_0 = arith.constant 0 : index
    %0 = vector.load %arg1[%c0, %c0_0] : memref<16x32xbf16, #tpu.memory_space<vmem>>, vector<16x32xbf16>
    %c0_1 = arith.constant 0 : index
    %c0_2 = arith.constant 0 : index
    %1 = vector.load %arg2[%c0_1, %c0_2] : memref<32x128xbf16, #tpu.memory_space<vmem>>, vector<32x128xbf16>
    %cst = arith.constant dense<0.000000e+00> : vector<16x128xf32>
    %2 = tpu.matmul %0, %1, %cst {dimension_numbers = #tpu.dot_dimension_numbers<[1], [0], [0], [1], [0, 0, 1, 1], [], []>} : vector<16x32xbf16>, vector<32x128xbf16>, vector<16x128xf32> -> vector<16x128xf32>
    %c0_3 = arith.constant 0 : index
    %c0_4 = arith.constant 0 : index
    %3 = vector.load %arg3[%c0_3, %c0_4] : memref<1x128xf32, #tpu.memory_space<vmem>>, vector<1x128xf32>
    %4 = vector.broadcast %3 : vector<1x128xf32> to vector<16x128xf32>
    %5 = arith.addf %2, %4 : vector<16x128xf32>
    %cst_5 = arith.constant 0.000000e+00 : f32
    %6 = vector.broadcast %cst_5 : f32 to vector<16x128xf32>
    %7 = arith.maximumf %5, %6 : vector<16x128xf32>
    %8 = arith.truncf %7 : vector<16x128xf32> to vector<16x128xbf16>
    %c0_6 = arith.constant 0 : index
    %c0_7 = arith.constant 0 : index
    %9 = vector.load %arg4[%c0_6, %c0_7] : memref<128x32xbf16, #tpu.memory_space<vmem>>, vector<128x32xbf16>
    %cst_8 = arith.constant dense<0.000000e+00> : vector<16x32xf32>
    %10 = tpu.matmul %8, %9, %cst_8 {dimension_numbers = #tpu.dot_dimension_numbers<[1], [0], [0], [1], [0, 0, 1, 1], [], []>} : vector<16x128xbf16>, vector<128x32xbf16>, vector<16x32xf32> -> vector<16x32xf32>
    %c0_9 = arith.constant 0 : index
    %c0_10 = arith.constant 0 : index
    %11 = vector.load %arg5[%c0_9, %c0_10] : memref<1x32xf32, #tpu.memory_space<vmem>>, vector<1x32xf32>
    %12 = vector.broadcast %11 : vector<1x32xf32> to vector<16x32xf32>
    %13 = arith.addf %10, %12 : vector<16x32xf32>
    %c0_11 = arith.constant 0 : index
    %c0_12 = arith.constant 0 : index
    %14 = vector.load %arg6[%c0_11, %c0_12] : memref<16x32xf32, #tpu.memory_space<vmem>>, vector<16x32xf32>
    tpu.vector_store %arg6[%c0_11, %c0_12], %13 {strides = array<i32>} : memref<16x32xf32, #tpu.memory_space<vmem>>, vector<16x32xf32>,
    return
  }
  func.func @transform_0(%arg0: i32) -> (i32, i32) {
    %c0_i32 = arith.constant 0 : i32
    %c0_i32_0 = arith.constant 0 : i32
    return %arg0, %c0_i32 : i32, i32
  }
  func.func @transform_1(%arg0: i32) -> (i32, i32) {
    %c0_i32 = arith.constant 0 : i32
    %c0_i32_0 = arith.constant 0 : i32
    %c0_i32_1 = arith.constant 0 : i32
    return %c0_i32, %c0_i32_0 : i32, i32
  }
  func.func @transform_2(%arg0: i32) -> (i32, i32) {
    %c0_i32 = arith.constant 0 : i32
    %c0_i32_0 = arith.constant 0 : i32
    %c0_i32_1 = arith.constant 0 : i32
    return %c0_i32, %c0_i32_0 : i32, i32
  }
  func.func @transform_3(%arg0: i32) -> (i32, i32) {
    %c0_i32 = arith.constant 0 : i32
    %c0_i32_0 = arith.constant 0 : i32
    %c0_i32_1 = arith.constant 0 : i32
    return %c0_i32, %c0_i32_0 : i32, i32
  }
  func.func @transform_4(%arg0: i32) -> (i32, i32) {
    %c0_i32 = arith.constant 0 : i32
    %c0_i32_0 = arith.constant 0 : i32
    %c0_i32_1 = arith.constant 0 : i32
    return %c0_i32, %c0_i32_0 : i32, i32
  }
  func.func @transform_5(%arg0: i32) -> (i32, i32) {
    %c0_i32 = arith.constant 0 : i32
    %c0_i32_0 = arith.constant 0 : i32
    return %arg0, %c0_i32 : i32, i32
  }
}

</mosaic_0001>

<bundles_post_ra>
// kernel: feed_forward_layer.1
= control target key start
LH: loop header
LB: loop body
LE: loop exit
PB: predicated region body
PF: predicated region fallthrough
CT: control target
= control target key end

     0   :  { %v324_v1 = vmov 0.0   ;;  %vm325_vm0 = vmmov 0   ;;  %vm52_vm1 = vcmask 261120   ;;  %s413_s0 = inlined_call_operand.vmem [shape: bf16[16,32], index: 0, kind: input, shape index: {}]   ;;  %s414_s1 = inlined_call_operand.vmem [shape: bf16[32,128], index: 1, kind: input, shape index: {}]   ;;  %s415_s2 = inlined_call_operand.vmem [shape: f32[1,128], index: 2, kind: input, shape index: {}]   ;;  %s416_s3 = inlined_call_operand.vmem [shape: bf16[128,32], index: 3, kind: input, shape index: {}]   ;;  %s417_s4 = inlined_call_operand.vmem [shape: f32[1,32], index: 4, kind: input, shape index: {}]   ;;  %s418_s5 = inlined_call_operand.hbm [shape: f32[16,32], index: 5, kind: output, shape index: {}]  }
   0x1   :  { %v289_v0 = vld [vmem:[%s414_s1] sm:$0xff]   ;;  %256 = vmatprep.subr.bf16.mxu0 %v324_v1  ;;  %264 = vmatprep.subr.bf16.mxu1 %v324_v1  ;;  %v290_v2 = vld [vmem:[%s414_s1 + $0x8] sm:$0xff]   ;;  %v294_v6 = vld [vmem:[%s416_s3 + $0x10] sm:$0xff]  }
   0x2   :  { %257 = vmatpush3.bf16.msra.mxu0 %v289_v0  ;;  %260 = vmatprep.mubr.msk.bf16.mxu0 %vm325_vm0, %v324_v1  ;;  %v292_v3 = vld [vmem:[%s416_s3] sm:$0xff]   ;;  %v293_v5 = vld [vmem:[%s416_s3 + $0x8] sm:$0xff]  }
   0x3   :  { %258 = vmatprep.subr.bf16.mxu0 %v324_v1  ;;  %280 = vmatprep.mubr.msk.bf16.mxu1 %vm325_vm0, %v324_v1  ;;  %v291_v4 = vld [vmem:[%s413_s0] sm:$0xff]  }
   0x4   :  { %265 = vmatpush3.bf16.msra.mxu1 %v292_v3 }
   0x5   :  { %266 = vmatprep.subr.bf16.mxu1 %v324_v1 }
   0x6   :  { %259 = vmatpush3.bf16.msra.mxu0 %v290_v2 }
   0x8   :  { %267 = vmatpush3.bf16.msra.mxu1 %v293_v5 }
   0x9   :  { %261 = vmatmul.mubr.msk.bf16.vlgmr.msra.gmra.mrb[0].mxu0 %vm52_vm1, %v291_v4  ;;  %268 = vmatprep.subr.bf16.mxu1 %v324_v1 }
   0xa   :  { %10 = vsyncpa [#allocation3], 0  ;;  %v295_v7 = vld [vmem:[%s416_s3 + $0x18] sm:$0xff]   ;;  %v296_v8 = vld [vmem:[%s416_s3 + $0x20] sm:$0xff]  }
   0xb   :  { %v297_v9 = vld [vmem:[%s416_s3 + $0x28] sm:$0xff]   ;;  %v298_v10 = vld [vmem:[%s416_s3 + $0x30] sm:$0xff]   ;;  %v299_v11 = vld [vmem:[%s416_s3 + $0x38] sm:$0xff]   ;;  %s326_s3 = smov [#allocation2]  }
   0xc   :  { %269 = vmatpush3.bf16.msra.mxu1 %v294_v6  ;;  %v230_v12 = vld [vmem:[%s415_s2] ss:$0 sm:$0xff]  ;;  %s219_s17 = sshll.u32 %s326_s3, 4  ;;  %s220_s17 = int_to_ptr.vmem [resolvable:$true] %s219_s17 }
   0xd   :  { %270 = vmatprep.subr.bf16.mxu1 %v324_v1  ;;  %v235_v22 = vld [vmem:[%s417_s4] ss:$0 sm:$0xff]  ;;  %s300_s2 = scalar_lea.vmem %s220_s17, 256  ;;  %p305_p1 = scmp.lt.s32.totalorder %s220_s17, %s220_s17 }
   0xe   :  { %p301_p0 = scmp.ne.s32.totalorder %s220_s17, %s300_s2  ;;  %p306_p2 = scmp.lt.s32.totalorder %s300_s2, %s300_s2 }
  0x10   :  { %271 = vmatpush3.bf16.msra.mxu1 %v295_v7  ;;  %p307_p3 = por %p306_p2, %p305_p1 }
  0x11   :  { %272 = vmatprep.subr.bf16.mxu1 %v324_v1 }
  0x12   :  { %p308_p4 = pnand %p307_p3, %p301_p0 }
  0x14   :  { %273 = vmatpush3.bf16.msra.mxu1 %v296_v8 }
  0x15   :  { %274 = vmatprep.subr.bf16.mxu1 %v324_v1 }
  0x18   :  { %275 = vmatpush3.bf16.msra.mxu1 %v297_v9 }
  0x19   :  { %276 = vmatprep.subr.bf16.mxu1 %v324_v1 }
  0x1c   :  { %277 = vmatpush3.bf16.msra.mxu1 %v298_v10 }
  0x1d   :  { %278 = vmatprep.subr.bf16.mxu1 %v324_v1 }
  0x20   :  { %279 = vmatpush3.bf16.msra.mxu1 %v299_v11 }
  0xdc   :  { %v90_v13 = vpop.f32.mrb[0].mxu0 }
  0xdd   :  { %v91_v14 = vadd.f32 %v230_v12, %v90_v13  ;;  %v262_v15 = vpop.f32.mrb[1].mxu0 }
  0xde   :  { %v93_v16 = vpop.f32.mrb[2].mxu0 }
  0xdf   :  { %v94_v17 = vadd.f32 %v230_v12, %v93_v16  ;;  %v263_v18 = vpop.f32.mrb[3].mxu0  ;;  %v97_v19 = vmax.f32 %v91_v14, 0.0 }
  0xe1   :  { %v98_v20 = vmax.f32 %v94_v17, 0.0 }
  0xe3   :  { %v99_v21 = vpack.c.bf16 %v98_v20, %v97_v19 }
  0xe5   :  { %281 = vmatmul.mubr.bf16.vlgmr.msra.gmra.mrb[0].mxu1 %v99_v21 }
 0x1b8   :  { %v205_v23 = vpop.f32.mrb[0].mxu1 }
 0x1b9   :  { %v206_v24 = vadd.f32 %v235_v22, %v205_v23  ;;  %v282_v25 = vpop.f32.mrb[1].mxu1 }
 0x1ba   :  { %v208_v26 = vpop.f32.mrb[2].mxu1 }
 0x1bb   :  { %212 = vst.msk [vmem:[#allocation2] sm:$0xff] %vm52_vm1, %v206_v24  ;;  %v209_v27 = vadd.f32 %v235_v22, %v208_v26  ;;  %v283_v28 = vpop.f32.mrb[3].mxu1 }
 0x1bd   :  { %213 = vst.msk [vmem:[#allocation2 + $0x8] sm:$0xff] %vm52_vm1, %v209_v27 }
 0x1be   :  { %311 = shalt.err (!%p308_p4)
}
 0x1bf   :  { %s312_s19 = scalar_lea.hbm %s418_s5, 256 }
 0x1c0   :  { %p313_p5 = scmp.ne.s32.totalorder %s418_s5, %s312_s19  ;;  %p316_p6 = scmp.lt.u32.totalorder %s312_s19, %s418_s5 }
 0x1c2   :  { %p318_p7 = pnand %p316_p6, %p313_p5 }
 0x1c4   :  { %321 = shalt.err (!%p318_p7)
}
 0x1c5   :  { %s327_s24 = smov 128   ;;  %s328_s25 = smov 8  }
 0x1c6   :  { %225 = dma.vmem_to_hbm [thread:$0]  %s220_s17, 256, %s418_s5, [#allocation3], %s327_s24, %s327_s24, %s328_s25  }
 0x1c7   :  { %322 = dma.done.wait [#allocation3], 256  }
 0x1c8   :  { %323 = vsyncadd [#allocation3], 4294967040 }
 0x1c9   :  { %229 = vsyncpa [#allocation3], 1 }

</bundles_post_ra>
